<compile_context>
chip_gen: v6e
topology: v6e:2x2x1
jax: 0.10.0
libtpu: 0.0.40
codegen_flags: <defaults>
</compile_context>

<pallas_src>
import functools

import jax
import jax.numpy as jnp
from jax.experimental import pallas as pl
from jax.experimental.pallas import tpu as pltpu


# ---------------------------------------------------------------------------
# Pass 1: per-(n, c) instance statistics of the style half x[:B].
# ---------------------------------------------------------------------------
def _stats_kernel(x_ref, mean_ref, std_ref, *, hw, hw_tile, eps):
    """Tiled single-pass mean/std over the spatial (lane) axis.

    x_ref   : (1, C, hw_tile)  one batch row, one HW tile of the style half
    mean_ref: (1, C, 1) f32    running sum   -> mean (finalized on last tile)
    std_ref : (1, C, 1) f32    running sumsq -> std  (finalized on last tile)
    """
    j = pl.program_id(1)

    @pl.when(j == 0)
    def _init():
        mean_ref[...] = jnp.zeros_like(mean_ref)
        std_ref[...] = jnp.zeros_like(std_ref)

    x = x_ref[0].astype(jnp.float32)                         # (C, hw_tile)
    if hw % hw_tile != 0:
        # Mask columns past the true spatial extent (last, partial tile).
        col = jax.lax.broadcasted_iota(jnp.int32, x.shape, 1) + j * hw_tile
        x = jnp.where(col < hw, x, 0.0)

    mean_ref[...] += jnp.sum(x, axis=-1, keepdims=True)[None, :, :]
    std_ref[...] += jnp.sum(x * x, axis=-1, keepdims=True)[None, :, :]

    @pl.when(j == pl.num_programs(1) - 1)
    def _finalize():
        s = mean_ref[...]                                    # total sum
        sq = std_ref[...]                                    # total sum of squares
        mu = s * (1.0 / hw)
        # unbiased variance (ddof=1) + eps, matches torch .var(dim=2) + 1e-5
        var = (sq - s * mu) / (hw - 1) + eps
        mean_ref[...] = mu
        std_ref[...] = jnp.sqrt(var)


# ---------------------------------------------------------------------------
# Pass 2: x_a = x[B:] * std_mod + mean_mod, written in place into x.
# ---------------------------------------------------------------------------
def _modulate_kernel(x_ref, std_ref, mean_ref, out_ref):
    x = x_ref[...].astype(jnp.float32)            # (1, C, hw_tile)
    out = x * std_ref[...] + mean_ref[...]        # (1, C, 1) broadcast over lanes
    out_ref[...] = out.astype(out_ref.dtype)


def _pick_hw_tile(hw, max_tile=2048):
    # Full HW if it fits a modest tile, else a 128-multiple tile; boundary
    # tiles are handled by masking (stats) / write clipping (modulation).
    return hw if hw <= max_tile else max_tile


@functools.partial(jax.jit, static_argnames=("training",), donate_argnums=(0,))
def cuti_forward(x, w_mean, w_std, training=True):
    """x: (N, C, H, W).  w_mean / w_std: (C, C, 1, 1) conv1x1 weights (no bias)."""
    if not training:
        return x

    N, C, H, W = x.shape
    B = N // 2
    hw = H * W
    hw_tile = _pick_hw_tile(hw)
    grid_hw = pl.cdiv(hw, hw_tile)

    x_flat = x.reshape(N, C, hw)  # layout-preserving, no copy

    # --- pass 1: tiled instance statistics over the style half x[:B] ---------
    mean, std = pl.pallas_call(
        functools.partial(_stats_kernel, hw=hw, hw_tile=hw_tile, eps=1e-5),
        grid=(B, grid_hw),
        in_specs=[pl.BlockSpec((1, C, hw_tile), lambda b, j: (b, 0, j))],
        out_specs=[
            pl.BlockSpec((1, C, 1), lambda b, j: (b, 0, 0)),
            pl.BlockSpec((1, C, 1), lambda b, j: (b, 0, 0)),
        ],
        out_shape=[
            jax.ShapeDtypeStruct((B, C, 1), jnp.float32),
            jax.ShapeDtypeStruct((B, C, 1), jnp.float32),
        ],
        compiler_params=pltpu.CompilerParams(
            dimension_semantics=("parallel", "arbitrary")),
    )(x_flat)

    # --- tiny (B,C)@(C,C) matmuls + sigmoid: negligible FLOPs, plain JAX -----
    wm = w_mean.reshape(C, C).astype(jnp.float32)        # (Cout, Cin)
    ws = w_std.reshape(C, C).astype(jnp.float32)
    mean_mod = jax.nn.sigmoid(mean[:, :, 0] @ wm.T)[:, :, None]   # (B, C, 1) f32
    std_mod = jax.nn.sigmoid(std[:, :, 0] @ ws.T)[:, :, None]     # (B, C, 1) f32

    # --- pass 2: in-place modulation of the content half ---------------------
    # x_flat is aliased to the output: only blocks of the second half are
    # written; the first half passes through untouched (no concat, no copy of
    # the style half when the caller donates x).
    out_flat = pl.pallas_call(
        _modulate_kernel,
        grid=(B, grid_hw),
        in_specs=[
            pl.BlockSpec((1, C, hw_tile), lambda b, j: (b + B, 0, j)),
            pl.BlockSpec((1, C, 1), lambda b, j: (b, 0, 0)),
            pl.BlockSpec((1, C, 1), lambda b, j: (b, 0, 0)),
        ],
        out_specs=pl.BlockSpec((1, C, hw_tile), lambda b, j: (b + B, 0, j)),
        out_shape=jax.ShapeDtypeStruct((N, C, hw), x.dtype),
        input_output_aliases={0: 0},
        compiler_params=pltpu.CompilerParams(
            dimension_semantics=("parallel", "parallel")),
    )(x_flat, std_mod, mean_mod)

    return out_flat.reshape(N, C, H, W)


def _reference(x, w_mean, w_std):
    """Pure-JAX reference reproducing the PyTorch forward."""
    N, C, H, W = x.shape
    B = N // 2
    x1 = x[:B].reshape(B, C, -1)
    mean = x1.mean(axis=2)
    var = x1.var(axis=2, ddof=1) + 1e-5
    std = jnp.sqrt(var)
    wm = w_mean.reshape(C, C)
    ws = w_std.reshape(C, C)
    mean_mod = jax.nn.sigmoid(mean @ wm.T)[:, :, None, None]
    std_mod = jax.nn.sigmoid(std @ ws.T)[:, :, None, None]
    x_a = x[B:] * std_mod + mean_mod
    return jnp.concatenate([x[:B], x_a], axis=0)


if __name__ == "__main__":
    key = jax.random.PRNGKey(0)
    k_x, k_wm, k_ws = jax.random.split(key, 3)

    N, C, H, W = 4, 4, 16, 16  # N must be even; B = N // 2 = 2
    x = jax.random.normal(k_x, (N, C, H, W), dtype=jnp.float32)

    # Deterministic conv1x1 weights (shape (Cout, Cin, 1, 1)).
    bound = 1.0 / jnp.sqrt(jnp.float32(C))
    w_mean = jax.random.uniform(k_wm, (C, C, 1, 1), jnp.float32, -bound, bound)
    w_std = jax.random.uniform(k_ws, (C, C, 1, 1), jnp.float32, -bound, bound)

    # Reference first: x is donated into the jitted kernel call below.
    ref = jax.block_until_ready(_reference(x, w_mean, w_std))

    out = cuti_forward(x, w_mean, w_std, training=True)
    out = jax.block_until_ready(out)

    assert out.shape == (N, C, H, W)
    assert jnp.allclose(out, ref, atol=1e-4, rtol=1e-4), "mismatch vs reference"
    print("KERNEL_OK")
</pallas_src>

<mosaic_0001>
module attributes {stable_mosaic.version = 11 : i64} {
  func.func @_stats_kernel(%arg0: i32, %arg1: i32, %arg2: memref<1x4x256xf32, #tpu.memory_space<vmem>>, %arg3: memref<1x4x1xf32, #tpu.memory_space<vmem>>, %arg4: memref<1x4x1xf32, #tpu.memory_space<vmem>>) attributes {dimension_semantics = [#tpu.dimension_semantics<parallel>, #tpu.dimension_semantics<arbitrary>], iteration_bounds = array<i64: 2, 1>, scalar_prefetch = 0 : i64, scratch_operands = 0 : i64, tpu.core_type = #tpu.core_type<tc>, window_params = [{transform_indices = @transform_0, window_bounds = array<i64: 1, 4, 256>}, {transform_indices = @transform_1, window_bounds = array<i64: 1, 4, 1>}, {transform_indices = @transform_2, window_bounds = array<i64: 1, 4, 1>}]} {
    %c0_i32 = arith.constant 0 : i32
    %0 = arith.cmpi eq, %arg1, %c0_i32 : i32
    %1 = arith.extui %0 : i1 to i32
    %c0_i32_0 = arith.constant 0 : i32
    %2 = arith.cmpi ne, %1, %c0_i32_0 : i32
    scf.if %2 {
      %cst_18 = arith.constant 0.000000e+00 : f32
      %21 = vector.broadcast %cst_18 : f32 to vector<1x4x1xf32>
      %c0_19 = arith.constant 0 : index
      %c0_20 = arith.constant 0 : index
      %c0_21 = arith.constant 0 : index
      %22 = vector.load %arg3[%c0_19, %c0_20, %c0_21] : memref<1x4x1xf32, #tpu.memory_space<vmem>>, vector<1x4x1xf32>
      tpu.vector_store %arg3[%c0_19, %c0_20, %c0_21], %21 {strides = array<i32>} : memref<1x4x1xf32, #tpu.memory_space<vmem>>, vector<1x4x1xf32>,
      %cst_22 = arith.constant 0.000000e+00 : f32
      %23 = vector.broadcast %cst_22 : f32 to vector<1x4x1xf32>
      %c0_23 = arith.constant 0 : index
      %c0_24 = arith.constant 0 : index
      %c0_25 = arith.constant 0 : index
      %24 = vector.load %arg4[%c0_23, %c0_24, %c0_25] : memref<1x4x1xf32, #tpu.memory_space<vmem>>, vector<1x4x1xf32>
      tpu.vector_store %arg4[%c0_23, %c0_24, %c0_25], %23 {strides = array<i32>} : memref<1x4x1xf32, #tpu.memory_space<vmem>>, vector<1x4x1xf32>,
    } else {
    }
    %c0 = arith.constant 0 : index
    %c0_1 = arith.constant 0 : index
    %c0_2 = arith.constant 0 : index
    %3 = vector.load %arg2[%c0, %c0_1, %c0_2] : memref<1x4x256xf32, #tpu.memory_space<vmem>>, vector<1x4x256xf32>
    %4 = vector.shape_cast %3 : vector<1x4x256xf32> to vector<4x256xf32>
    %c0_3 = arith.constant 0 : index
    %c0_4 = arith.constant 0 : index
    %c0_5 = arith.constant 0 : index
    %5 = vector.load %arg3[%c0_3, %c0_4, %c0_5] : memref<1x4x1xf32, #tpu.memory_space<vmem>>, vector<1x4x1xf32>
    %cst = arith.constant dense<0.000000e+00> : vector<4xf32>
    %6 = vector.multi_reduction <add>, %4, %cst [1] : vector<4x256xf32> to vector<4xf32>
    %7 = vector.shape_cast %6 : vector<4xf32> to vector<4x1xf32>
    %8 = vector.shape_cast %7 : vector<4x1xf32> to vector<1x4x1xf32>
    %9 = arith.addf %5, %8 : vector<1x4x1xf32>
    %c0_6 = arith.constant 0 : index
    %c0_7 = arith.constant 0 : index
    %c0_8 = arith.constant 0 : index
    %10 = vector.load %arg3[%c0_6, %c0_7, %c0_8] : memref<1x4x1xf32, #tpu.memory_space<vmem>>, vector<1x4x1xf32>
    tpu.vector_store %arg3[%c0_6, %c0_7, %c0_8], %9 {strides = array<i32>} : memref<1x4x1xf32, #tpu.memory_space<vmem>>, vector<1x4x1xf32>,
    %c0_9 = arith.constant 0 : index
    %c0_10 = arith.constant 0 : index
    %c0_11 = arith.constant 0 : index
    %11 = vector.load %arg4[%c0_9, %c0_10, %c0_11] : memref<1x4x1xf32, #tpu.memory_space<vmem>>, vector<1x4x1xf32>
    %12 = arith.mulf %4, %4 : vector<4x256xf32>
    %cst_12 = arith.constant dense<0.000000e+00> : vector<4xf32>
    %13 = vector.multi_reduction <add>, %12, %cst_12 [1] : vector<4x256xf32> to vector<4xf32>
    %14 = vector.shape_cast %13 : vector<4xf32> to vector<4x1xf32>
    %15 = vector.shape_cast %14 : vector<4x1xf32> to vector<1x4x1xf32>
    %16 = arith.addf %11, %15 : vector<1x4x1xf32>
    %c0_13 = arith.constant 0 : index
    %c0_14 = arith.constant 0 : index
    %c0_15 = arith.constant 0 : index
    %17 = vector.load %arg4[%c0_13, %c0_14, %c0_15] : memref<1x4x1xf32, #tpu.memory_space<vmem>>, vector<1x4x1xf32>
    tpu.vector_store %arg4[%c0_13, %c0_14, %c0_15], %16 {strides = array<i32>} : memref<1x4x1xf32, #tpu.memory_space<vmem>>, vector<1x4x1xf32>,
    %c0_i32_16 = arith.constant 0 : i32
    %18 = arith.cmpi eq, %arg1, %c0_i32_16 : i32
    %19 = arith.extui %18 : i1 to i32
    %c0_i32_17 = arith.constant 0 : i32
    %20 = arith.cmpi ne, %19, %c0_i32_17 : i32
    scf.if %20 {
      %c0_18 = arith.constant 0 : index
      %c0_19 = arith.constant 0 : index
      %c0_20 = arith.constant 0 : index
      %21 = vector.load %arg3[%c0_18, %c0_19, %c0_20] : memref<1x4x1xf32, #tpu.memory_space<vmem>>, vector<1x4x1xf32>
      %c0_21 = arith.constant 0 : index
      %c0_22 = arith.constant 0 : index
      %c0_23 = arith.constant 0 : index
      %22 = vector.load %arg4[%c0_21, %c0_22, %c0_23] : memref<1x4x1xf32, #tpu.memory_space<vmem>>, vector<1x4x1xf32>
      %cst_24 = arith.constant 3.906250e-03 : f32
      %23 = vector.broadcast %cst_24 : f32 to vector<1x4x1xf32>
      %24 = arith.mulf %21, %23 : vector<1x4x1xf32>
      %25 = arith.mulf %21, %24 : vector<1x4x1xf32>
      %26 = arith.subf %22, %25 : vector<1x4x1xf32>
      %cst_25 = arith.constant 2.550000e+02 : f32
      %27 = vector.broadcast %cst_25 : f32 to vector<1x4x1xf32>
      %28 = arith.divf %26, %27 : vector<1x4x1xf32>
      %cst_26 = arith.constant 9.99999974E-6 : f32
      %29 = vector.broadcast %cst_26 : f32 to vector<1x4x1xf32>
      %30 = arith.addf %28, %29 : vector<1x4x1xf32>
      %c0_27 = arith.constant 0 : index
      %c0_28 = arith.constant 0 : index
      %c0_29 = arith.constant 0 : index
      %31 = vector.load %arg3[%c0_27, %c0_28, %c0_29] : memref<1x4x1xf32, #tpu.memory_space<vmem>>, vector<1x4x1xf32>
      tpu.vector_store %arg3[%c0_27, %c0_28, %c0_29], %24 {strides = array<i32>} : memref<1x4x1xf32, #tpu.memory_space<vmem>>, vector<1x4x1xf32>,
      %32 = math.sqrt %30 : vector<1x4x1xf32>
      %c0_30 = arith.constant 0 : index
      %c0_31 = arith.constant 0 : index
      %c0_32 = arith.constant 0 : index
      %33 = vector.load %arg4[%c0_30, %c0_31, %c0_32] : memref<1x4x1xf32, #tpu.memory_space<vmem>>, vector<1x4x1xf32>
      tpu.vector_store %arg4[%c0_30, %c0_31, %c0_32], %32 {strides = array<i32>} : memref<1x4x1xf32, #tpu.memory_space<vmem>>, vector<1x4x1xf32>,
    } else {
    }
    return
  }
  func.func @transform_0(%arg0: i32, %arg1: i32) -> (i32, i32, i32) {
    %c0_i32 = arith.constant 0 : i32
    %c0_i32_0 = arith.constant 0 : i32
    return %arg0, %c0_i32, %arg1 : i32, i32, i32
  }
  func.func @transform_1(%arg0: i32, %arg1: i32) -> (i32, i32, i32) {
    %c0_i32 = arith.constant 0 : i32
    %c0_i32_0 = arith.constant 0 : i32
    %c0_i32_1 = arith.constant 0 : i32
    return %arg0, %c0_i32, %c0_i32_0 : i32, i32, i32
  }
  func.func @transform_2(%arg0: i32, %arg1: i32) -> (i32, i32, i32) {
    %c0_i32 = arith.constant 0 : i32
    %c0_i32_0 = arith.constant 0 : i32
    %c0_i32_1 = arith.constant 0 : i32
    return %arg0, %c0_i32, %c0_i32_0 : i32, i32, i32
  }
}

module attributes {stable_mosaic.version = 11 : i64} {
  func.func @_modulate_kernel(%arg0: i32, %arg1: i32, %arg2: memref<1x4x256xf32, #tpu.memory_space<vmem>>, %arg3: memref<1x4x1xf32, #tpu.memory_space<vmem>>, %arg4: memref<1x4x1xf32, #tpu.memory_space<vmem>>, %arg5: memref<1x4x256xf32, #tpu.memory_space<vmem>>) attributes {dimension_semantics = [#tpu.dimension_semantics<parallel>, #tpu.dimension_semantics<parallel>], iteration_bounds = array<i64: 2, 1>, scalar_prefetch = 0 : i64, scratch_operands = 0 : i64, tpu.core_type = #tpu.core_type<tc>, window_params = [{transform_indices = @transform_0, window_bounds = array<i64: 1, 4, 256>}, {transform_indices = @transform_1, window_bounds = array<i64: 1, 4, 1>}, {transform_indices = @transform_2, window_bounds = array<i64: 1, 4, 1>}, {transform_indices = @transform_3, window_bounds = array<i64: 1, 4, 256>}]} {
    %c0 = arith.constant 0 : index
    %c0_0 = arith.constant 0 : index
    %c0_1 = arith.constant 0 : index
    %0 = vector.load %arg2[%c0, %c0_0, %c0_1] : memref<1x4x256xf32, #tpu.memory_space<vmem>>, vector<1x4x256xf32>
    %c0_2 = arith.constant 0 : index
    %c0_3 = arith.constant 0 : index
    %c0_4 = arith.constant 0 : index
    %1 = vector.load %arg3[%c0_2, %c0_3, %c0_4] : memref<1x4x1xf32, #tpu.memory_space<vmem>>, vector<1x4x1xf32>
    %2 = vector.broadcast %1 : vector<1x4x1xf32> to vector<1x4x256xf32>
    %3 = arith.mulf %0, %2 : vector<1x4x256xf32>
    %c0_5 = arith.constant 0 : index
    %c0_6 = arith.constant 0 : index
    %c0_7 = arith.constant 0 : index
    %4 = vector.load %arg4[%c0_5, %c0_6, %c0_7] : memref<1x4x1xf32, #tpu.memory_space<vmem>>, vector<1x4x1xf32>
    %5 = vector.broadcast %4 : vector<1x4x1xf32> to vector<1x4x256xf32>
    %6 = arith.addf %3, %5 : vector<1x4x256xf32>
    %c0_8 = arith.constant 0 : index
    %c0_9 = arith.constant 0 : index
    %c0_10 = arith.constant 0 : index
    %7 = vector.load %arg5[%c0_8, %c0_9, %c0_10] : memref<1x4x256xf32, #tpu.memory_space<vmem>>, vector<1x4x256xf32>
    tpu.vector_store %arg5[%c0_8, %c0_9, %c0_10], %6 {strides = array<i32>} : memref<1x4x256xf32, #tpu.memory_space<vmem>>, vector<1x4x256xf32>,
    return
  }
  func.func @transform_0(%arg0: i32, %arg1: i32) -> (i32, i32, i32) {
    %c2_i32 = arith.constant 2 : i32
    %0 = arith.addi %arg0, %c2_i32 : i32
    %c0_i32 = arith.constant 0 : i32
    %c0_i32_0 = arith.constant 0 : i32
    return %0, %c0_i32, %arg1 : i32, i32, i32
  }
  func.func @transform_1(%arg0: i32, %arg1: i32) -> (i32, i32, i32) {
    %c0_i32 = arith.constant 0 : i32
    %c0_i32_0 = arith.constant 0 : i32
    %c0_i32_1 = arith.constant 0 : i32
    return %arg0, %c0_i32, %c0_i32_0 : i32, i32, i32
  }
  func.func @transform_2(%arg0: i32, %arg1: i32) -> (i32, i32, i32) {
    %c0_i32 = arith.constant 0 : i32
    %c0_i32_0 = arith.constant 0 : i32
    %c0_i32_1 = arith.constant 0 : i32
    return %arg0, %c0_i32, %c0_i32_0 : i32, i32, i32
  }
  func.func @transform_3(%arg0: i32, %arg1: i32) -> (i32, i32, i32) {
    %c2_i32 = arith.constant 2 : i32
    %0 = arith.addi %arg0, %c2_i32 : i32
    %c0_i32 = arith.constant 0 : i32
    %c0_i32_0 = arith.constant 0 : i32
    return %0, %c0_i32, %arg1 : i32, i32, i32
  }
}

</mosaic_0001>

<bundles_post_ra>
// kernel: cuti_forward.2
= control target key start
LH: loop header
LB: loop body
LE: loop exit
PB: predicated region body
PF: predicated region fallthrough
CT: control target
= control target key end

     0   :  { %s412_s9 = smov 0   ;;  %s414_s10 = smov 0   ;;  %s454_s0 = inlined_call_operand.vmem [shape: f32[4,4,256], index: 0, kind: input, shape index: {}]   ;;  %s455_s1 = inlined_call_operand.vmem [shape: f32[2,4,1], index: 1, kind: output, shape index: {0}]   ;;  %s456_s2 = inlined_call_operand.vmem [shape: f32[2,4,1], index: 2, kind: output, shape index: {1}]  }
   0x1   :  { %s416_s11 = smov 0  }
   0x2 LB: > { %s25_s12 = sadd.s32 1, %s390_s10  ;;  %p336_p0 = scmp.ge.s32.totalorder %s394_s11, 1  ;;  %s394_s11 = sphi %s416_s11, %s13_s11   ;;  %s390_s10 = sphi %s414_s10, %s458_s10   ;;  %s386_s9 = sphi %s412_s9, %s457_s9  }
   0x3   : > { %p27_p1 = scmp.ge.s32.totalorder %s25_s12, 2  ;;  %p134_p2 = scmp.lt.s32.totalorder %s394_s11, 3 }
   0x5   : > { %s460_s12 = smov (%p27_p1, %s25_s12), 0  ;;  %p135_p3 = pnand %p336_p0, %p134_p2 }
   0x6   : > { %p164_p4 = scmp.lt.s32.totalorder (!%p135_p3), %s386_s9, 3  ;;  %p173_p5 = scmp.lt.s32.totalorder (!%p135_p3), %s386_s9, 1 }
   0x7   : > { %138 = sbr.rel (%p135_p3) target bundleno = 199 (0xc7), region = 24 }
   0xc   : > { %s165_s13 = scalar_select %p164_p4, %s386_s9, 3  ;;  %vm193_vm0 = vcmask 1043456   ;;  %vm185_vm1 = vcmask 3072   ;;  %v396_v4 = vmov 0.0  }
   0xd   : > { %s462_s9 = smov (!%p173_p5, %s386_s9), 1 }
   0xe   : > { %s343_s14 = sshll.u32 %s165_s13, 3  ;;  %s339_s18 = sshll.u32 %s462_s9, 2 }
   0xf   : > { %s171_s17 = scalar_lea.vmem %s454_s0, %s343_s14  ;;  %s176_s21 = scalar_lea.vmem %s455_s1, %s339_s18 }
  0x10   : > { %v188_v0 = vld [vmem:[%s171_s17] sm:$0xff]  ;;  %186 = vst.msk [vmem:[%s176_s21] sm:$0xf] %vm185_vm1, %v396_v4  ;;  %s180_s24 = scalar_lea.vmem %s456_s2, %s339_s18 }
  0x11   : > { %v191_v1 = vcombine.high %v188_v0, %v188_v0  ;;  %v194_v2 = vsel %vm193_vm0, %v188_v0, 0.0  ;;  %v203_v3 = vmul.f32 %v188_v0, %v188_v0  ;;  %187 = vst.msk [vmem:[%s180_s24] sm:$0xf] %vm185_vm1, %v396_v4 }
  0x13   : > { %v195_v5 = vsel %vm193_vm0, %v191_v1, 0.0  ;;  %v205_v6 = vcombine.high %v203_v3, %v203_v3  ;;  %v207_v7 = vsel %vm193_vm0, %v203_v3, 0.0 }
  0x14   : > { %v196_v8 = vadd.f32 %v195_v5, %v194_v2 }
  0x15   : > { %v208_v9 = vsel %vm193_vm0, %v205_v6, 0.0 }
  0x16   : > { %197 = vadd.xlane.f32.xlu0 %v196_v8  ;;  %v209_v10 = vadd.f32 %v208_v9, %v207_v7 }
  0x17   : > { %v189_v11 = vld [vmem:[%s176_s21] sm:$0xf] }
  0x18   : > { %v202_v14 = vld [vmem:[%s180_s24] sm:$0xf] }
  0x1a   : > { %210 = vadd.xlane.f32.xlu0 %v209_v10 }
  0x9f   : > { %v198_v12 = vpop.xlane.xlu0 %197 }
  0xa0   : > { %v199_v13 = vadd.f32 %v198_v12, %v189_v11 }
  0xa2   : > { %201 = vst.msk [vmem:[%s176_s21] sm:$0xf] %vm185_vm1, %v199_v13 }
  0xa3   : > { %v211_v15 = vpop.xlane.xlu0 %210 }
  0xa4   : > { %v212_v16 = vadd.f32 %v211_v15, %v202_v14 }
  0xa6   : > { %213 = vst.msk [vmem:[%s180_s24] sm:$0xf] %vm185_vm1, %v212_v16 }
  0xa9   : > { %v217_v17 = vld [vmem:[%s176_s21] sm:$0xf] }
  0xaa   : > { %v219_v18 = vmul.f32 0.00390625, %v217_v17 }
  0xac   : > { %v220_v19 = vmul.f32 %v219_v18, %v217_v17  ;;  %225 = vst.msk [vmem:[%s176_s21] sm:$0xf] %vm185_vm1, %v219_v18 }
  0xad   : > { %v218_v20 = vld [vmem:[%s180_s24] sm:$0xf] }
  0xae   : > { %v221_v21 = vsub.f32 %v218_v20, %v220_v19 }
  0xb0   : > { %v223_v22 = vmul.f32 0.003921569, %v221_v21 }
  0xb2   : > { %v224_v23 = vadd.f32 1e-05, %v223_v22 }
  0xb4   : > { %370 = vrsqrt.f32 %v224_v23  ;;  %vm228_vm2 = vcmp.eq.f32.partialorder %v224_v23, inf  ;;  %v231_v26 = vand.u32 2147483648, %v224_v23  ;;  %vm230_vm3 = vcmp.eq.f32.partialorder %v224_v23, 0.0 }
  0xc1   : > { %v371_v24 = vpop.eup %370 }
  0xc2   : > { %v227_v25 = vmul.f32 %v371_v24, %v224_v23 }
  0xc4   : > { %v229_v27 = vsel %vm228_vm2, %v224_v23, %v227_v25 }
  0xc5   : > { %v232_v28 = vsel %vm230_vm3, %v231_v26, %v229_v27 }
  0xc6   : > { %233 = vst.msk [vmem:[%s180_s24] sm:$0xf] %vm185_vm1, %v232_v28 }
  0xc7 PF: > { %s13_s11 = sadd.s32 1, %s394_s11   ;;  %s457_s9 = smov %s390_s10 }
  0xc8   : > { %p10_p6 = scmp.ge.s32.totalorder %s13_s11, 4   ;;  %s458_s10 = smov %s460_s12 }
  0xca   :  { %12 = sbr.rel (!%p10_p6) target bundleno = 2 (0x2), region = 74 }

// kernel: cuti_forward.3
= control target key start
LH: loop header
LB: loop body
LE: loop exit
PB: predicated region body
PF: predicated region fallthrough
CT: control target
= control target key end

     0   :  { %s488_s12 = smov 0   ;;  %s490_s13 = smov 0   ;;  %s527_s0 = inlined_call_operand.vmem [shape: f32[4,4,256], index: 0, kind: input, shape index: {}, may-alias: {0,3}]   ;;  %s528_s1 = inlined_call_operand.vmem [shape: f32[2,4,1], index: 1, kind: input, shape index: {}]   ;;  %s529_s2 = inlined_call_operand.vmem [shape: f32[2,4,1], index: 2, kind: input, shape index: {}]   ;;  %s530_s3 = inlined_call_operand.vmem [shape: f32[4,4,256], index: 3, kind: output, shape index: {}, may-alias: {0,3}]  }
   0x1   :  { %s492_s14 = smov 0  }
   0x2 LB: > { %s25_s15 = sadd.s32 1, %s460_s13  ;;  %p404_p0 = scmp.ge.s32.totalorder %s464_s14, 1  ;;  %s464_s14 = sphi %s492_s14, %s13_s14   ;;  %s460_s13 = sphi %s490_s13, %s532_s13   ;;  %s456_s12 = sphi %s488_s12, %s531_s12  }
   0x3   : > { %p27_p1 = scmp.ge.s32.totalorder %s25_s15, 2  ;;  %p182_p2 = scmp.lt.s32.totalorder %s464_s14, 3 }
   0x5   : > { %s534_s15 = smov (%p27_p1, %s25_s15), 0  ;;  %p183_p3 = pnand %p404_p0, %p182_p2 }
   0x6   : > { %p236_p4 = scmp.lt.s32.totalorder (!%p183_p3), %s456_s12, 1  ;;  %s224_s24 = sadd.s32 (!%p183_p3), 2, %s456_s12 }
   0x7   : > { %186 = sbr.rel (%p183_p3) target bundleno = 150 (0x96), region = 32  ;;  %p226_p5 = scmp.lt.s32.totalorder (!%p183_p3), %s224_s24, 3 }
   0xc   : > { %v466_v0 = vmov 0   ;;  %s237_s16 = scalar_select %p236_p4, %s456_s12, 1  ;;  %v467_v3 = vmov 839922192   ;;  %v265_v5 = vlaneseq }
   0xd   : > { %441 = vset.pattern.permute.xlu0 %v466_v0  ;;  %v263_v4 = vunpack.c.l.s4 %v467_v3  ;;  %s536_s24 = smov (!%p226_p5, %s224_s24), 3 }
   0xe   : > { %s407_s17 = sshll.u32 %s237_s16, 2  ;;  %v266_v7 = vshrl.u32 %v265_v5, 7  ;;  %s413_s25 = sshll.u32 %s536_s24, 3 }
   0xf   : > { %s239_s20 = scalar_lea.vmem %s528_s1, %s407_s17  ;;  %s243_s23 = scalar_lea.vmem %s529_s2, %s407_s17  ;;  %v264_v6 = vunpack.c.0.s8 %v263_v4 }
  0x10   : > { %v257_v1 = vld [vmem:[%s239_s20] sm:$0xf]  ;;  %s233_s28 = scalar_lea.vmem %s527_s0, %s413_s25  ;;  %s253_s4 = scalar_lea.vmem %s530_s3, %s413_s25 }
  0x11   : > { %260 = vperm.xlu0 %441, %v257_v1   ;;  %v271_v2 = vld [vmem:[%s243_s23] sm:$0xf]  ;;  %v267_v8 = vsub.s32 %v264_v6, %v266_v7 }
  0x12   : > { %v256_v11 = vld [vmem:[%s233_s28] sm:$0xff] }
  0x15   : > { %274 = vperm.xlu0 %441, %v271_v2  }
  0x8c   : > { %v261_v9 = vpop.permute.xlu0 %260 }
  0x8d   : > { %v268_v10 = vrot.slane %v261_v9, %v267_v8 }
  0x8f   : > { %v270_v13 = vmul.f32 %v268_v10, %v256_v11 }
  0x90   : > { %v275_v12 = vpop.permute.xlu0 %274 }
  0x91   : > { %v282_v14 = vrot.slane %v275_v12, %v267_v8 }
  0x93   : > { %v284_v15 = vadd.f32 %v282_v14, %v270_v13 }
  0x95   : > { %285 = vst [vmem:[%s253_s4] sm:$0xff] %v284_v15 }
  0x96 PF: > { %s13_s14 = sadd.s32 1, %s464_s14   ;;  %s531_s12 = smov %s460_s13 }
  0x97   : > { %p10_p6 = scmp.ge.s32.totalorder %s13_s14, 4   ;;  %s532_s13 = smov %s534_s15 }
  0x99   :  { %12 = sbr.rel (!%p10_p6) target bundleno = 2 (0x2), region = 68 }

</bundles_post_ra>
